<compile_context>
chip_gen: v7x
topology: tpu7x:2x2x1
jax: 0.10.0
libtpu: 0.0.40
codegen_flags: <defaults>
</compile_context>

<pallas_src>
import jax
import jax.numpy as jnp
from jax.experimental import pallas as pl
from jax.experimental.pallas import tpu as pltpu


def _round_up(x, m):
    return (x + m - 1) // m * m


def _patch_embed_kernel(xp_ref, w_ref, posb_ref, out_ref, acc_ref):
    # xp_ref  : (tile_m, tile_k) bf16  patch rows (batch-collapsed)
    # w_ref   : (tile_k, tile_n) bf16  conv weight slab (matmul RHS)
    # posb_ref: (tile_m, tile_n) f32   position embedding + conv bias (per row)
    # out_ref : (tile_m, tile_n) f32
    # acc_ref : (tile_m, tile_n) f32   VMEM accumulator over the K grid axis
    kt = pl.program_id(2)

    @pl.when(kt == 0)
    def _():
        acc_ref[...] = jnp.zeros_like(acc_ref)

    acc_ref[...] += jnp.dot(xp_ref[...], w_ref[...],
                            preferred_element_type=jnp.float32)

    @pl.when(kt == pl.num_programs(2) - 1)
    def _():
        out_ref[...] = (acc_ref[...] + posb_ref[...]).astype(out_ref.dtype)


def vvt_embd_patch(x, conv_w, conv_b, cls_token, pos_embed, *, patch_size):
    """Forward pass of VVTEmbdPatch (eval-mode dropout == identity).

    x         : (B, T, H, W, C)
    conv_w    : (E, C_in, ph, pw) with C_in == T * C
    conv_b    : (E,)
    cls_token : (1, 1, E)
    pos_embed : (1, n_patches + 1, E)
    returns   : (B, n_patches + 1, E) float32
    """
    B, T, H, W, C = x.shape
    E, C_in, ph, pw = conv_w.shape
    assert C_in == T * C, "config.in_channels must equal T*C"
    assert (ph, pw) == tuple(patch_size)
    Hp, Wp = H // ph, W // pw
    n_patches = Hp * Wp
    K = C_in * ph * pw
    M = B * n_patches                       # batch-collapsed token rows

    # ---- tile selection ----------------------------------------------------
    m8 = _round_up(M, 8)
    tile_m = m8 if m8 <= 1024 else 512      # single M-tile when it fits
    m_pad = _round_up(M, tile_m)

    k128 = _round_up(K, 128)
    tile_k = k128 if k128 <= 1024 else 1024
    k_pad = _round_up(k128, tile_k)

    e128 = _round_up(E, 128)
    tile_n = e128 if e128 <= 1024 else 512
    e_pad = _round_up(e128, tile_n)

    # ---- glue: patchify in bf16 (halves the materialized transpose copy) ----
    # TODO(synk): fuse patch extraction into the kernel DMA (grid over row-blocks
    # of x + in-kernel reorg) so x is read from HBM only once.
    x_bf = x.astype(jnp.bfloat16)
    # torch.reshape(x, [B, T*C, H, W]) is a raw row-major reinterpretation;
    # jnp.reshape has identical semantics.
    x_nchw = jnp.reshape(x_bf, (B, C_in, H, W))
    xp = x_nchw.reshape(B, C_in, Hp, ph, Wp, pw)
    xp = xp.transpose(0, 2, 4, 1, 3, 5).reshape(M, K)      # (B*n_patches, K)
    if m_pad != M or k_pad != K:
        xp = jnp.pad(xp, ((0, m_pad - M), (0, k_pad - K)))

    # conv weight as matmul RHS: (E, C_in, ph, pw) -> (K, E), bf16
    w_mat = conv_w.reshape(E, K).T.astype(jnp.bfloat16)
    if k_pad != K or e_pad != E:
        w_mat = jnp.pad(w_mat, ((0, k_pad - K), (0, e_pad - E)))

    # fold conv bias into the patch-token position embeddings and replicate per
    # batch (tiny vs. the weight stream; keeps a single in-kernel add).
    posb = (pos_embed[0, 1:, :] + conv_b[None, :]).astype(jnp.float32)
    posb = jnp.tile(posb, (B, 1))                          # (M, E)
    if m_pad != M or e_pad != E:
        posb = jnp.pad(posb, ((0, m_pad - M), (0, e_pad - E)))

    grid = (m_pad // tile_m, e_pad // tile_n, k_pad // tile_k)

    # Explicit VMEM budget: double-buffered blocks + accumulator + headroom,
    # clamped so it also fits v7x's 64 MiB physical VMEM per TensorCore.
    blk_bytes = (2 * tile_m * tile_k * 2        # patches (bf16), double-buffered
                 + 2 * tile_k * tile_n * 2      # weight  (bf16)
                 + 2 * tile_m * tile_n * 4      # posb    (f32)
                 + 2 * tile_m * tile_n * 4      # out     (f32)
                 + tile_m * tile_n * 4)         # accumulator
    vmem_limit = int(min(max(blk_bytes + (2 << 20), 16 << 20), 64 << 20))

    out2d = pl.pallas_call(
        _patch_embed_kernel,
        out_shape=jax.ShapeDtypeStruct((m_pad, e_pad), jnp.float32),
        grid_spec=pltpu.PrefetchScalarGridSpec(
            num_scalar_prefetch=0,
            grid=grid,
            in_specs=[
                pl.BlockSpec((tile_m, tile_k), lambda m, n, k: (m, k)),
                pl.BlockSpec((tile_k, tile_n), lambda m, n, k: (k, n)),
                pl.BlockSpec((tile_m, tile_n), lambda m, n, k: (m, n)),
            ],
            out_specs=pl.BlockSpec((tile_m, tile_n), lambda m, n, k: (m, n)),
            scratch_shapes=[pltpu.VMEM((tile_m, tile_n), jnp.float32)],
        ),
        compiler_params=pltpu.CompilerParams(
            dimension_semantics=("parallel", "parallel", "arbitrary"),
            vmem_limit_bytes=vmem_limit),
    )(xp, w_mat, posb)

    patch_tokens = out2d[:M, :E].reshape(B, n_patches, E)

    # cls token row: broadcast + its position embedding (tiny glue: 1 row/batch).
    cls_row = jnp.broadcast_to((cls_token + pos_embed[:, :1, :]).astype(jnp.float32),
                               (B, 1, E))

    # TODO(synk): training-mode dropout (config.dropout_rate) not applied; eval semantics (identity).
    return jnp.concatenate([cls_row, patch_tokens], axis=1)


def _reference(x, conv_w, conv_b, cls_token, pos_embed, patch_size):
    """Pure-JAX f32 reference mirroring the PyTorch forward."""
    B, T, H, W, C = x.shape
    E = conv_w.shape[0]
    ph, pw = patch_size
    x_nchw = jnp.reshape(x, (B, T * C, H, W))
    y = jax.lax.conv_general_dilated(
        x_nchw, conv_w, window_strides=(ph, pw), padding="VALID",
        dimension_numbers=("NCHW", "OIHW", "NCHW"))
    y = y + conv_b.reshape(1, E, 1, 1)
    y = y.reshape(B, E, -1).transpose(0, 2, 1)          # flatten(2).transpose(-1,-2)
    cls = jnp.broadcast_to(cls_token, (B, 1, E))
    y = jnp.concatenate([cls, y], axis=1)
    return y + pos_embed


if __name__ == "__main__":
    # Small synthetic config: img_size=32, patches=8, T=2, C=2 -> in_channels=4,
    # n_patches = (32//8)*(32//8) = 16, embd_size=128, dropout_rate=0.0.
    B, T, H, W, C = 2, 2, 32, 32, 2
    ph = pw = 8
    C_in = T * C
    E = 128
    n_patches = (H // ph) * (W // pw)

    key = jax.random.PRNGKey(0)
    kx, kw, kb, kcls, kpos = jax.random.split(key, 5)
    x = jax.random.normal(kx, (B, T, H, W, C), dtype=jnp.float32)
    conv_w = 0.05 * jax.random.normal(kw, (E, C_in, ph, pw), dtype=jnp.float32)
    conv_b = 0.05 * jax.random.normal(kb, (E,), dtype=jnp.float32)
    # Module inits these to zeros; use small deterministic values to exercise the adds.
    cls_token = 0.1 * jax.random.normal(kcls, (1, 1, E), dtype=jnp.float32)
    pos_embed = 0.1 * jax.random.normal(kpos, (1, n_patches + 1, E), dtype=jnp.float32)

    out = vvt_embd_patch(x, conv_w, conv_b, cls_token, pos_embed, patch_size=(ph, pw))
    out = jax.block_until_ready(out)

    ref = _reference(x, conv_w, conv_b, cls_token, pos_embed, (ph, pw))
    assert out.shape == (B, n_patches + 1, E), out.shape
    # bf16 patch/weight path vs f32 reference -> loosened tolerance.
    assert jnp.allclose(out, ref, atol=5e-2, rtol=5e-2), float(jnp.max(jnp.abs(out - ref)))
    print("KERNEL_OK")
</pallas_src>

<mosaic_0001>
module attributes {stable_mosaic.version = 11 : i64} {
  func.func @_patch_embed_kernel(%arg0: i32, %arg1: i32, %arg2: i32, %arg3: memref<32x256xbf16, #tpu.memory_space<vmem>>, %arg4: memref<256x128xbf16, #tpu.memory_space<vmem>>, %arg5: memref<32x128xf32, #tpu.memory_space<vmem>>, %arg6: memref<32x128xf32, #tpu.memory_space<vmem>>, %arg7: memref<32x128xf32, #tpu.memory_space<vmem>>) attributes {dimension_semantics = [#tpu.dimension_semantics<parallel>, #tpu.dimension_semantics<parallel>, #tpu.dimension_semantics<arbitrary>], iteration_bounds = array<i64: 1, 1, 1>, scalar_prefetch = 0 : i64, scratch_operands = 1 : i64, tpu.core_type = #tpu.core_type<tc>, window_params = [{transform_indices = @transform_0, window_bounds = array<i64: 32, 256>}, {transform_indices = @transform_1, window_bounds = array<i64: 256, 128>}, {transform_indices = @transform_2, window_bounds = array<i64: 32, 128>}, {transform_indices = @transform_3, window_bounds = array<i64: 32, 128>}]} {
    %c0_i32 = arith.constant 0 : i32
    %0 = arith.cmpi eq, %arg2, %c0_i32 : i32
    %1 = arith.extui %0 : i1 to i32
    %c0_i32_0 = arith.constant 0 : i32
    %2 = arith.cmpi ne, %1, %c0_i32_0 : i32
    scf.if %2 {
      %cst_10 = arith.constant 0.000000e+00 : f32
      %12 = vector.broadcast %cst_10 : f32 to vector<32x128xf32>
      %c0_11 = arith.constant 0 : index
      %c0_12 = arith.constant 0 : index
      %13 = vector.load %arg7[%c0_11, %c0_12] : memref<32x128xf32, #tpu.memory_space<vmem>>, vector<32x128xf32>
      tpu.vector_store %arg7[%c0_11, %c0_12], %12 {strides = array<i32>} : memref<32x128xf32, #tpu.memory_space<vmem>>, vector<32x128xf32>,
    } else {
    }
    %c0 = arith.constant 0 : index
    %c0_1 = arith.constant 0 : index
    %3 = vector.load %arg7[%c0, %c0_1] : memref<32x128xf32, #tpu.memory_space<vmem>>, vector<32x128xf32>
    %c0_2 = arith.constant 0 : index
    %c0_3 = arith.constant 0 : index
    %4 = vector.load %arg3[%c0_2, %c0_3] : memref<32x256xbf16, #tpu.memory_space<vmem>>, vector<32x256xbf16>
    %c0_4 = arith.constant 0 : index
    %c0_5 = arith.constant 0 : index
    %5 = vector.load %arg4[%c0_4, %c0_5] : memref<256x128xbf16, #tpu.memory_space<vmem>>, vector<256x128xbf16>
    %cst = arith.constant dense<0.000000e+00> : vector<32x128xf32>
    %6 = tpu.matmul %4, %5, %cst {dimension_numbers = #tpu.dot_dimension_numbers<[1], [0], [0], [1], [0, 0, 1, 1], [], []>} : vector<32x256xbf16>, vector<256x128xbf16>, vector<32x128xf32> -> vector<32x128xf32>
    %7 = arith.addf %3, %6 : vector<32x128xf32>
    %c0_6 = arith.constant 0 : index
    %c0_7 = arith.constant 0 : index
    %8 = vector.load %arg7[%c0_6, %c0_7] : memref<32x128xf32, #tpu.memory_space<vmem>>, vector<32x128xf32>
    tpu.vector_store %arg7[%c0_6, %c0_7], %7 {strides = array<i32>} : memref<32x128xf32, #tpu.memory_space<vmem>>, vector<32x128xf32>,
    %c0_i32_8 = arith.constant 0 : i32
    %9 = arith.cmpi eq, %arg2, %c0_i32_8 : i32
    %10 = arith.extui %9 : i1 to i32
    %c0_i32_9 = arith.constant 0 : i32
    %11 = arith.cmpi ne, %10, %c0_i32_9 : i32
    scf.if %11 {
      %c0_10 = arith.constant 0 : index
      %c0_11 = arith.constant 0 : index
      %12 = vector.load %arg7[%c0_10, %c0_11] : memref<32x128xf32, #tpu.memory_space<vmem>>, vector<32x128xf32>
      %c0_12 = arith.constant 0 : index
      %c0_13 = arith.constant 0 : index
      %13 = vector.load %arg5[%c0_12, %c0_13] : memref<32x128xf32, #tpu.memory_space<vmem>>, vector<32x128xf32>
      %14 = arith.addf %12, %13 : vector<32x128xf32>
      %c0_14 = arith.constant 0 : index
      %c0_15 = arith.constant 0 : index
      %15 = vector.load %arg6[%c0_14, %c0_15] : memref<32x128xf32, #tpu.memory_space<vmem>>, vector<32x128xf32>
      tpu.vector_store %arg6[%c0_14, %c0_15], %14 {strides = array<i32>} : memref<32x128xf32, #tpu.memory_space<vmem>>, vector<32x128xf32>,
    } else {
    }
    return
  }
  func.func @transform_0(%arg0: i32, %arg1: i32, %arg2: i32) -> (i32, i32) {
    %c0_i32 = arith.constant 0 : i32
    return %arg0, %arg2 : i32, i32
  }
  func.func @transform_1(%arg0: i32, %arg1: i32, %arg2: i32) -> (i32, i32) {
    %c0_i32 = arith.constant 0 : i32
    return %arg2, %arg1 : i32, i32
  }
  func.func @transform_2(%arg0: i32, %arg1: i32, %arg2: i32) -> (i32, i32) {
    %c0_i32 = arith.constant 0 : i32
    return %arg0, %arg1 : i32, i32
  }
  func.func @transform_3(%arg0: i32, %arg1: i32, %arg2: i32) -> (i32, i32) {
    %c0_i32 = arith.constant 0 : i32
    return %arg0, %arg1 : i32, i32
  }
}

</mosaic_0001>

<bundles_post_ra>
// kernel: tpu_custom_call.1
= control target key start
LH: loop header
LB: loop body
LE: loop exit
PB: predicated region body
PF: predicated region fallthrough
CT: control target
= control target key end

     0   :  { %8 = vsyncpa [#allocation4], 0  ;;  %s588_s0 = inlined_call_operand.hbm [shape: bf16[32,256], index: 0, kind: input, shape index: {}]   ;;  %s589_s1 = inlined_call_operand.hbm [shape: bf16[256,128], index: 1, kind: input, shape index: {}]   ;;  %s590_s2 = inlined_call_operand.hbm [shape: f32[32,128], index: 2, kind: input, shape index: {}]   ;;  %s591_s3 = inlined_call_operand.hbm [shape: f32[32,128], index: 3, kind: output, shape index: {}]  }
   0x1   :  { %9 = vsyncpa [#allocation7], 0 }
   0x2   :  { %10 = vsyncpa [#allocation5], 0  ;;  %s503_s12 = smov [#allocation6]   ;;  %s409_s16 = scalar_lea.hbm %s589_s1, 2048 }
   0x3   :  { %s28_s13 = sshll.u32 %s503_s12, 4  ;;  %p410_p0 = scmp.ne.s32.totalorder %s589_s1, %s409_s16  ;;  %s29_s13 = int_to_ptr.vmem [resolvable:$true] %s28_s13 }
   0x4   :  { %p413_p1 = scmp.lt.u32.totalorder %s409_s16, %s589_s1 }
   0x6   :  { %p415_p2 = pnand %p413_p1, %p410_p0 }
   0x8   :  { %418 = shalt.err (!%p415_p2)
}
   0x9   :  { %s419_s21 = scalar_lea.vmem %s29_s13, 2048  ;;  %p424_p4 = scmp.lt.s32.totalorder %s29_s13, %s29_s13 }
   0xa   :  { %p420_p3 = scmp.ne.s32.totalorder %s29_s13, %s419_s21  ;;  %p425_p5 = scmp.lt.s32.totalorder %s419_s21, %s419_s21 }
   0xc   :  { %p426_p6 = por %p425_p5, %p424_p4 }
   0xe   :  { %p427_p7 = pnand %p426_p6, %p420_p3 }
  0x10   :  { %430 = shalt.err (!%p427_p7)
}
  0x11   :  { %s504_s22 = smov 64   ;;  %s505_s23 = smov 4  }
  0x12   :  { %34 = dma.hbm_to_vmem [thread:$0]  %s589_s1, 2048, %s29_s13, [#allocation7], %s504_s22, %s504_s22, %s505_s23  }
  0x13   :  { %s506_s26 = smov [#allocation3]   ;;  %s431_s30 = scalar_lea.hbm %s588_s0, 512 }
  0x14   :  { %s16_s27 = sshll.u32 %s506_s26, 4  ;;  %p432_p8 = scmp.ne.s32.totalorder %s588_s0, %s431_s30  ;;  %s17_s27 = int_to_ptr.vmem [resolvable:$true] %s16_s27 }
  0x15   :  { %p435_p9 = scmp.lt.u32.totalorder %s431_s30, %s588_s0 }
  0x17   :  { %p437_p10 = pnand %p435_p9, %p432_p8 }
  0x19   :  { %440 = shalt.err (!%p437_p10)
}
  0x1a   :  { %s441_s8 = scalar_lea.vmem %s17_s27, 512  ;;  %p446_p12 = scmp.lt.s32.totalorder %s17_s27, %s17_s27 }
  0x1b   :  { %p442_p11 = scmp.ne.s32.totalorder %s17_s27, %s441_s8  ;;  %p447_p13 = scmp.lt.s32.totalorder %s441_s8, %s441_s8 }
  0x1d   :  { %p448_p0 = por %p447_p13, %p446_p12 }
  0x1f   :  { %p449_p1 = pnand %p448_p0, %p442_p11 }
  0x21   :  { %452 = shalt.err (!%p449_p1)
}
  0x22   :  { %s507_s1 = smov 128   ;;  %s508_s9 = smov 8  }
  0x23   :  { %22 = dma.hbm_to_vmem [thread:$0]  %s588_s0, 512, %s17_s27, [#allocation4], %s507_s1, %s507_s1, %s508_s9  }
  0x24   :  { %s509_s12 = smov [#allocation8]   ;;  %s453_s16 = scalar_lea.hbm %s590_s2, 512 }
  0x25   :  { %s40_s13 = sshll.u32 %s509_s12, 4  ;;  %p454_p2 = scmp.ne.s32.totalorder %s590_s2, %s453_s16  ;;  %s41_s13 = int_to_ptr.vmem [resolvable:$true] %s40_s13 }
  0x26   :  { %p457_p3 = scmp.lt.u32.totalorder %s453_s16, %s590_s2 }
  0x28   :  { %p459_p4 = pnand %p457_p3, %p454_p2 }
  0x2a   :  { %462 = shalt.err (!%p459_p4)
}
  0x2b   :  { %s463_s21 = scalar_lea.vmem %s41_s13, 512  ;;  %p468_p6 = scmp.lt.s32.totalorder %s41_s13, %s41_s13 }
  0x2c   :  { %p464_p5 = scmp.ne.s32.totalorder %s41_s13, %s463_s21  ;;  %p469_p7 = scmp.lt.s32.totalorder %s463_s21, %s463_s21 }
  0x2e   :  { %p470_p8 = por %p469_p7, %p468_p6 }
  0x30   :  { %p471_p9 = pnand %p470_p8, %p464_p5 }
  0x32   :  { %474 = shalt.err (!%p471_p9)
}
  0x33   :  { %46 = dma.hbm_to_vmem [thread:$0]  %s590_s2, 512, %s41_s13, [#allocation7], %s507_s1, %s507_s1, %s508_s9  }
  0x34   :  { %497 = dma.done.wait [#allocation4], 512  }
  0x35   :  { %498 = vsyncadd [#allocation4], 4294966784 }
  0x36   :  { %499 = dma.done.wait [#allocation7], 2560  }
  0x37   :  { %500 = vsyncadd [#allocation7], 4294964736  ;;  %v387_v0 = vld [vmem:[#allocation6 + $0x40] sm:$0xff]   ;;  %v389_v2 = vld [vmem:[#allocation6 + $0x48] sm:$0xff]   ;;  %s510_s2 = smov [#allocation9]  }
  0x38   :  { %v388_v1 = vld [vmem:[#allocation6] sm:$0xff]   ;;  %335 = vmatprep.subr.bf16.mxu0 %v387_v0  ;;  %363 = vmatprep.subr.bf16.mxu1 %v387_v0  ;;  %v390_v3 = vld [vmem:[#allocation6 + $0x8] sm:$0xff]   ;;  %v391_v4 = vld [vmem:[#allocation6 + $0x50] sm:$0xff]   ;;  %s302_s23 = sshll.u32 %s510_s2, 4  ;;  %s303_s23 = int_to_ptr.vmem [resolvable:$true] %s302_s23 }
  0x39   :  { %336 = vmatpush3.bf16.msra.mxu0 %v388_v1  ;;  %371 = vmatpush3.bf16.msra.mxu1 %v388_v1  ;;  %v392_v5 = vld [vmem:[#allocation6 + $0x10] sm:$0xff]   ;;  %v393_v6 = vld [vmem:[#allocation6 + $0x58] sm:$0xff]   ;;  %v395_v8 = vld [vmem:[#allocation6 + $0x60] sm:$0xff]   ;;  %s475_s24 = scalar_lea.vmem %s303_s23, 512  ;;  %p480_p11 = scmp.lt.s32.totalorder %s303_s23, %s303_s23 }
  0x3a   :  { %337 = vmatprep.subr.bf16.mxu0 %v389_v2  ;;  %364 = vmatprep.subr.bf16.mxu1 %v389_v2  ;;  %v394_v7 = vld [vmem:[#allocation6 + $0x18] sm:$0xff]   ;;  %v396_v9 = vld [vmem:[#allocation6 + $0x20] sm:$0xff]   ;;  %v397_v10 = vld [vmem:[#allocation6 + $0x68] sm:$0xff]   ;;  %p476_p10 = scmp.ne.s32.totalorder %s303_s23, %s475_s24  ;;  %p481_p12 = scmp.lt.s32.totalorder %s475_s24, %s475_s24 }
  0x3b   :  { %v405_v11 = vld [vmem:[#allocation3 + $0x4] ss:$8 sps:$4 sm:$0xff]   ;;  %v408_v12 = vld [vmem:[#allocation3 + $0x14] ss:$8 sps:$4 sm:$0xff]   ;;  %v403_v18 = vld [vmem:[#allocation3] ss:$8 sps:$4 sm:$0xff]  }
  0x3c   :  { %v398_v13 = vld [vmem:[#allocation6 + $0x28] sm:$0xff]   ;;  %v399_v14 = vld [vmem:[#allocation6 + $0x70] sm:$0xff]   ;;  %253 = vmatprep.mubr.bf16.mxu0 %v405_v11  ;;  %261 = vmatprep.mubr.bf16.mxu1 %v408_v12  ;;  %v401_v16 = vld [vmem:[#allocation6 + $0x78] sm:$0xff]   ;;  %p482_p13 = por %p481_p12, %p480_p11 }
  0x3d   :  { %338 = vmatpush3.bf16.msra.mxu0 %v390_v3  ;;  %372 = vmatpush3.bf16.msra.mxu1 %v390_v3  ;;  %v400_v15 = vld [vmem:[#allocation6 + $0x30] sm:$0xff]   ;;  %v402_v17 = vld [vmem:[#allocation6 + $0x38] sm:$0xff]   ;;  %v285_v23 = vld [vmem:[#allocation8] sm:$0xff] }
  0x3e   :  { %339 = vmatprep.subr.bf16.mxu0 %v391_v4  ;;  %365 = vmatprep.subr.bf16.mxu1 %v391_v4  ;;  %v406_v19 = vld [vmem:[#allocation3 + $0x10] ss:$8 sps:$4 sm:$0xff]   ;;  %v286_v31 = vld [vmem:[#allocation8 + $0x8] sm:$0xff]  ;;  %p483_p0 = pnand %p482_p13, %p476_p10 }
  0x3f   :  { %v287_v25 = vld [vmem:[#allocation8 + $0x10] sm:$0xff]  ;;  %v288_v33 = vld [vmem:[#allocation8 + $0x18] sm:$0xff] }
  0x41   :  { %340 = vmatpush3.bf16.msra.mxu0 %v392_v5  ;;  %373 = vmatpush3.bf16.msra.mxu1 %v392_v5 }
  0x42   :  { %341 = vmatprep.subr.bf16.mxu0 %v393_v6  ;;  %366 = vmatprep.subr.bf16.mxu1 %v393_v6 }
  0x45   :  { %342 = vmatpush3.bf16.msra.mxu0 %v394_v7  ;;  %374 = vmatpush3.bf16.msra.mxu1 %v394_v7 }
  0x46   :  { %343 = vmatprep.subr.bf16.mxu0 %v395_v8  ;;  %367 = vmatprep.subr.bf16.mxu1 %v395_v8 }
  0x49   :  { %344 = vmatpush3.bf16.msra.mxu0 %v396_v9  ;;  %375 = vmatpush3.bf16.msra.mxu1 %v396_v9 }
  0x4a   :  { %345 = vmatprep.subr.bf16.mxu0 %v397_v10  ;;  %368 = vmatprep.subr.bf16.mxu1 %v397_v10 }
  0x4d   :  { %346 = vmatpush3.bf16.msra.mxu0 %v398_v13  ;;  %376 = vmatpush3.bf16.msra.mxu1 %v398_v13 }
  0x4e   :  { %347 = vmatprep.subr.bf16.mxu0 %v399_v14  ;;  %369 = vmatprep.subr.bf16.mxu1 %v399_v14 }
  0x51   :  { %348 = vmatpush3.bf16.msra.mxu0 %v400_v15  ;;  %377 = vmatpush3.bf16.msra.mxu1 %v400_v15 }
  0x52   :  { %349 = vmatprep.subr.bf16.mxu0 %v401_v16  ;;  %370 = vmatprep.subr.bf16.mxu1 %v401_v16 }
  0x55   :  { %350 = vmatpush3.bf16.msra.mxu0 %v402_v17  ;;  %378 = vmatpush3.bf16.msra.mxu1 %v402_v17 }
  0x58   :  { %254 = vmatmul.mubr.bf16.vlgmr.msra.gmra.mrb[0].mxu0 %v403_v18  ;;  %262 = vmatmul.mubr.bf16.vlgmr.msra.gmra.mrb[0].mxu1 %v406_v19 }
 0x12b   :  { %v351_v20 = vpop.f32.mrb[0].mxu0  ;;  %v357_v21 = vpop.f32.mrb[0].mxu1 }
 0x12c   :  { %v352_v22 = vpop.f32.mrb[1].mxu0  ;;  %v358_v24 = vpop.f32.mrb[1].mxu1 }
 0x12d   :  { %v353_v26 = vadd.f32 %v352_v22, %v351_v20  ;;  %v359_v27 = vadd.f32 %v358_v24, %v357_v21  ;;  %v354_v28 = vpop.f32.mrb[2].mxu0  ;;  %v360_v29 = vpop.f32.mrb[2].mxu1 }
 0x12e   :  { %v355_v30 = vpop.f32.mrb[3].mxu0  ;;  %v361_v32 = vpop.f32.mrb[3].mxu1 }
 0x12f   :  { %v289_v34 = vadd.f32 %v353_v26, %v285_v23  ;;  %v291_v35 = vadd.f32 %v359_v27, %v287_v25  ;;  %v356_v36 = vadd.f32 %v355_v30, %v354_v28  ;;  %v362_v37 = vadd.f32 %v361_v32, %v360_v29 }
 0x131   :  { %293 = vst [vmem:[#allocation9] sm:$0xff] %v289_v34  ;;  %295 = vst [vmem:[#allocation9 + $0x10] sm:$0xff] %v291_v35  ;;  %v290_v38 = vadd.f32 %v356_v36, %v286_v31  ;;  %v292_v39 = vadd.f32 %v362_v37, %v288_v33 }
 0x133   :  { %294 = vst [vmem:[#allocation9 + $0x8] sm:$0xff] %v290_v38  ;;  %296 = vst [vmem:[#allocation9 + $0x18] sm:$0xff] %v292_v39 }
 0x134   :  { %486 = shalt.err (!%p483_p0)
}
 0x135   :  { %s487_s27 = scalar_lea.hbm %s591_s3, 512 }
 0x136   :  { %p488_p1 = scmp.ne.s32.totalorder %s591_s3, %s487_s27  ;;  %p491_p2 = scmp.lt.u32.totalorder %s487_s27, %s591_s3 }
 0x138   :  { %p493_p3 = pnand %p491_p2, %p488_p1 }
 0x13a   :  { %496 = shalt.err (!%p493_p3)
}
 0x13b   :  { %308 = dma.vmem_to_hbm [thread:$0]  %s303_s23, 512, %s591_s3, [#allocation5], %s507_s1, %s507_s1, %s508_s9  }
 0x13c   :  { %501 = dma.done.wait [#allocation5], 512  }
 0x13d   :  { %502 = vsyncadd [#allocation5], 4294966784 }
 0x13e   :  { %312 = vsyncpa [#allocation4], 1 }
 0x13f   :  { %313 = vsyncpa [#allocation7], 1 }
 0x140   :  { %314 = vsyncpa [#allocation5], 1 }

</bundles_post_ra>
